<compile_context>
chip_gen: v7x
topology: tpu7x:2x2x1
jax: 0.10.0
libtpu: 0.0.40
codegen_flags: <defaults>
</compile_context>

<pallas_src>
import functools

import jax
import jax.numpy as jnp
from jax.experimental import pallas as pl
from jax.experimental.pallas import tpu as pltpu


def _round_up(x: int, m: int) -> int:
    return ((x + m - 1) // m) * m


def _next_pow2(x: int) -> int:
    n = 1
    while n < x:
        n *= 2
    return n


# ----------------------------------------------------------------------------
# Pallas kernel (one batch tile per grid step)
# ----------------------------------------------------------------------------
def _object_encoder_kernel(idx_ref, parts_ref, mlp1_ref, mlp2_ref, *rest,
                           parts_pad, part_dim, pooling_method, compute_dtype):
    """Fused ObjectEncoder forward for one batch tile.

    idx_ref   : (Bt, 3) int32     vocab-offset [task, object, state] indices
    parts_ref : (Bt, 2P) f32      interleaved [x0,y0,x1,y1,...] part coords
    mlp1_ref  : (2P+1, Pp*H) f32  [block-diag W1 ; replicated b1]
    mlp2_ref  : (Pp*H+1, N) f32   max: [block-diag W2 ; replicated b2 (-BIG pad)]
                                  avg: [replicated W2/P placed ; b2 placed]
    place_ref : (Pp*D, OUT) f32   max only: 0/1 mask + placement matrix
    tab_ref   : (sum_vocab, OUT)  block-diagonal packed embedding tables
    out_ref   : (Bt, OUT) f32     lane-dense output slab
    """
    if pooling_method == "max":
        place_ref, tab_ref, out_ref = rest
    else:
        tab_ref, out_ref = rest

    Bt = parts_ref.shape[0]
    two_p = parts_ref.shape[1]
    pph = mlp2_ref.shape[0] - 1                    # Pp * H

    w1 = mlp1_ref[0:two_p, :]                      # (2P, Pp*H), block-diagonal
    b1 = mlp1_ref[two_p:two_p + 1, :]              # (1, Pp*H)
    w2 = mlp2_ref[0:pph, :]                        # (Pp*H, N)
    b2 = mlp2_ref[pph:pph + 1, :]                  # (1, N)

    # --- part-encoder layer 1, all parts in one lane-dense MXU matmul --------
    h = jnp.dot(parts_ref[...].astype(compute_dtype), w1.astype(compute_dtype),
                preferred_element_type=jnp.float32) + b1
    h = jnp.maximum(h, 0.0)                                   # (Bt, Pp*H)

    if pooling_method == "max":
        # Layer 2 for all parts in one block-diagonal matmul -> (Bt, Pp*D).
        pe = jnp.dot(h.astype(compute_dtype), w2.astype(compute_dtype),
                     preferred_element_type=jnp.float32) + b2
        # Tree max-reduction over the Pp part blocks (result lands in lanes
        # [0, D)); log2(Pp) roll+max pairs on the otherwise idle XLU slot.
        k = parts_pad // 2
        while k >= 1:
            pe = jnp.maximum(pe, pltpu.roll(pe, shift=k * part_dim, axis=1))
            k //= 2
        # 0/1 placement matmul (f32, exact): zeroes the reduction-garbage lanes
        # and drops the pooled vector at its lane offset in the output slab.
        pooled = jnp.dot(pe, place_ref[...], preferred_element_type=jnp.float32)
    else:  # 'avg': pooling commutes with the linear layer -> a single matmul.
        pooled = jnp.dot(h.astype(compute_dtype), w2.astype(compute_dtype),
                         preferred_element_type=jnp.float32) + b2   # (Bt, OUT)

    # --- fused embedding lookups: one-hot @ block-diag packed table (f32) ----
    # Indices carry their vocab offsets, so one matmul yields
    # [task | object | state] already placed in the lane-dense output slab.
    # NOTE: out-of-range indices silently produce all-zero embeddings.
    # TODO(synk): for vocabularies >> a few hundred rows, switch to scalar-
    # prefetched row gathers (PrefetchScalarGridSpec) and keep the big table
    # out of double-buffered VMEM residency.
    sum_vocab = tab_ref.shape[0]
    iota = jax.lax.broadcasted_iota(jnp.int32, (Bt, sum_vocab), 1)
    onehot = jnp.logical_or(
        jnp.logical_or(iota == idx_ref[:, 0:1], iota == idx_ref[:, 1:2]),
        iota == idx_ref[:, 2:3],
    ).astype(jnp.float32)                                      # 3 ones per row
    emb = jnp.dot(onehot, tab_ref[...], preferred_element_type=jnp.float32)

    # Embeddings and pooled occupy disjoint lane ranges -> sum == concat.
    out_ref[...] = emb + pooled      # single unmasked, full-lane-width store


# ----------------------------------------------------------------------------
# One-time parameter packing (hoisted out of the per-call path)
# ----------------------------------------------------------------------------
def pack_object_encoder_params(params, num_parts, pooling_method):
    P = int(num_parts)
    Pp = _next_pow2(P)                       # pad part count to a power of 2

    w1 = params["w1"].astype(jnp.float32)                    # (2, H)
    b1 = params["b1"].astype(jnp.float32).reshape(1, -1)     # (1, H)
    w2 = params["w2"].astype(jnp.float32)                    # (H, D)
    b2 = params["b2"].astype(jnp.float32).reshape(1, -1)     # (1, D)
    tt = params["task_table"].astype(jnp.float32)
    ot = params["object_table"].astype(jnp.float32)
    st = params["state_table"].astype(jnp.float32)

    H = w1.shape[1]
    D = w2.shape[1]
    Tv, Td = tt.shape
    Ov, Od = ot.shape
    Sv, Sd = st.shape
    emb_total = Td + Od + Sd
    out_dim = emb_total + D
    out_pad = max(128, _round_up(out_dim, 128))      # lane-dense output width

    # Layer 1: block-diagonal (2P, Pp*H) so one matmul covers every part.
    w1_big = jnp.kron(jnp.eye(P, dtype=jnp.float32), w1)       # (2P, P*H)
    w1_big = jnp.pad(w1_big, ((0, 0), (0, (Pp - P) * H)))
    b1_rep = jnp.pad(jnp.tile(b1, (1, P)), ((0, 0), (0, (Pp - P) * H)))
    mlp1 = jnp.concatenate([w1_big, b1_rep], axis=0)           # (2P+1, Pp*H)

    if pooling_method == "max":
        # Layer 2: block-diagonal (Pp*H, Pp*D); padded part blocks are zero and
        # carry a -BIG bias so they can never win the max.
        w2_diag = jnp.kron(jnp.eye(P, dtype=jnp.float32), w2)  # (P*H, P*D)
        w2_diag = jnp.pad(w2_diag, ((0, (Pp - P) * H), (0, (Pp - P) * D)))
        b2_rep = jnp.concatenate(
            [jnp.tile(b2, (1, P)),
             jnp.full((1, (Pp - P) * D), -1e30, jnp.float32)], axis=1)
        mlp2 = jnp.concatenate([w2_diag, b2_rep], axis=0)      # (Pp*H+1, Pp*D)
        # 0/1 mask + placement of the pooled D lanes at column offset emb_total.
        place = jnp.zeros((Pp * D, out_pad), jnp.float32)
        place = place.at[jnp.arange(D), emb_total + jnp.arange(D)].set(1.0)
    else:  # 'avg': fold the mean and the lane placement into layer 2 weights.
        w2_rep = jnp.tile(w2 / float(P), (P, 1))               # (P*H, D)
        w2_rep = jnp.pad(w2_rep, ((0, (Pp - P) * H), (0, 0)))
        w2_placed = jnp.zeros((Pp * H, out_pad), jnp.float32)
        w2_placed = w2_placed.at[:, emb_total:emb_total + D].set(w2_rep)
        b2_placed = jnp.zeros((1, out_pad), jnp.float32)
        b2_placed = b2_placed.at[:, emb_total:emb_total + D].set(b2)
        mlp2 = jnp.concatenate([w2_placed, b2_placed], axis=0)  # (Pp*H+1, OUT)
        place = None

    # Block-diagonal packed embedding tables: one-hot(offset idx) @ tab equals
    # the concatenation of the three gathers, already placed in the out slab.
    sum_vocab = Tv + Ov + Sv
    tab = jnp.zeros((sum_vocab, out_pad), jnp.float32)
    tab = tab.at[:Tv, :Td].set(tt)
    tab = tab.at[Tv:Tv + Ov, Td:Td + Od].set(ot)
    tab = tab.at[Tv + Ov:, Td + Od:Td + Od + Sd].set(st)

    return dict(
        mlp1=mlp1, mlp2=mlp2, place=place, tab=tab,
        num_parts=P, parts_pad=Pp, part_dim=D,
        task_vocab=Tv, object_vocab=Ov, state_vocab=Sv,
        emb_total=emb_total, out_dim=out_dim, out_pad=out_pad,
        pooling_method=pooling_method,
    )


# ----------------------------------------------------------------------------
# Forward wrapper: batch tiling + pallas_call
# ----------------------------------------------------------------------------
def object_encoder_forward(tasks, object_classes, states, parts, packed,
                           *, compute_dtype=jnp.float32, b_tile_cap=1024):
    pooling_method = packed["pooling_method"]
    P = packed["num_parts"]
    out_pad = packed["out_pad"]

    B = parts.shape[0]
    parts2d = parts.reshape(B, 2 * P).astype(jnp.float32)    # [x0,y0,x1,y1,...]
    idx = jnp.stack(
        [tasks.astype(jnp.int32),
         object_classes.astype(jnp.int32) + packed["task_vocab"],
         states.astype(jnp.int32) + packed["task_vocab"] + packed["object_vocab"]],
        axis=1)                                               # (B, 3)

    # Batch tiling: pad B up to a tile multiple (no B_tile=B fallback) so
    # pipelining and the v7x dual-TensorCore split survive arbitrary batches.
    # Sweep b_tile_cap 512-4096 on v6e; keep <= ~2048 on v7x (64 MiB VMEM).
    b_tile = min(b_tile_cap, _round_up(B, 8))
    bp = _round_up(B, b_tile)
    if bp != B:
        parts2d = jnp.pad(parts2d, ((0, bp - B), (0, 0)))
        idx = jnp.pad(idx, ((0, bp - B), (0, 0)))
    grid = (bp // b_tile,)

    kernel = functools.partial(
        _object_encoder_kernel,
        parts_pad=packed["parts_pad"], part_dim=packed["part_dim"],
        pooling_method=pooling_method, compute_dtype=compute_dtype)

    def batched(width):
        return pl.BlockSpec((b_tile, width), lambda i: (i, 0))

    def resident(arr):
        return pl.BlockSpec(arr.shape, lambda i: (0, 0))

    operands = [idx, parts2d, packed["mlp1"], packed["mlp2"]]
    in_specs = [batched(3), batched(2 * P),
                resident(packed["mlp1"]), resident(packed["mlp2"])]
    if pooling_method == "max":
        operands.append(packed["place"])
        in_specs.append(resident(packed["place"]))
    operands.append(packed["tab"])
    in_specs.append(resident(packed["tab"]))

    out = pl.pallas_call(
        kernel,
        out_shape=jax.ShapeDtypeStruct((bp, out_pad), jnp.float32),
        grid=grid,
        in_specs=in_specs,
        out_specs=batched(out_pad),
        compiler_params=pltpu.CompilerParams(
            dimension_semantics=("parallel",),     # shard batch tiles across TCs
            vmem_limit_bytes=32 * 1024 * 1024),    # explicit, v7x(64 MiB)-safe
    )(*operands)

    # Wrapper-side slice back to the real batch and real output width.
    return out[:B, :packed["out_dim"]]


# ----------------------------------------------------------------------------
# Pure-JAX reference (mirrors the PyTorch forward)
# ----------------------------------------------------------------------------
def object_encoder_reference(tasks, object_classes, states, parts, params,
                             pooling_method):
    B = parts.shape[0]
    parts3 = parts.reshape(B, -1, 2).astype(jnp.float32)
    h = jnp.maximum(parts3 @ params["w1"] + params["b1"], 0.0)
    pe = h @ params["w2"] + params["b2"]                      # (B, P, D)
    if pooling_method == "max":
        parts_encodes = jnp.max(pe, axis=1)
    else:
        parts_encodes = jnp.mean(pe, axis=1)
    return jnp.concatenate(
        [params["task_table"][tasks],
         params["object_table"][object_classes],
         params["state_table"][states],
         parts_encodes], axis=1)


# ----------------------------------------------------------------------------
if __name__ == "__main__":
    P, H = 8, 32
    TASK_VOCAB, OBJ_VOCAB, STATE_VOCAB = 16, 16, 16
    TASK_DIM, OBJ_DIM, STATE_DIM = 8, 8, 8
    PART_ENC_DIM = 16

    key = jax.random.PRNGKey(0)
    ks = jax.random.split(key, 10)
    params = {
        "w1": 0.1 * jax.random.normal(ks[0], (2, H), jnp.float32),
        "b1": 0.1 * jax.random.normal(ks[1], (H,), jnp.float32),
        "w2": 0.1 * jax.random.normal(ks[2], (H, PART_ENC_DIM), jnp.float32),
        "b2": 0.1 * jax.random.normal(ks[3], (PART_ENC_DIM,), jnp.float32),
        "task_table": jax.random.normal(ks[4], (TASK_VOCAB, TASK_DIM), jnp.float32),
        "object_table": jax.random.normal(ks[5], (OBJ_VOCAB, OBJ_DIM), jnp.float32),
        "state_table": jax.random.normal(ks[6], (STATE_VOCAB, STATE_DIM), jnp.float32),
    }
    out_dim = TASK_DIM + OBJ_DIM + STATE_DIM + PART_ENC_DIM

    def make_inputs(b, k):
        k1, k2, k3, k4 = jax.random.split(k, 4)
        return (jax.random.randint(k1, (b,), 0, TASK_VOCAB, jnp.int32),
                jax.random.randint(k2, (b,), 0, OBJ_VOCAB, jnp.int32),
                jax.random.randint(k3, (b,), 0, STATE_VOCAB, jnp.int32),
                jax.random.normal(k4, (b, P, 2), jnp.float32))

    for pooling in ("max", "avg"):
        packed = pack_object_encoder_params(params, num_parts=P,
                                            pooling_method=pooling)

        # Small batch, single tile, f32 matmuls (strict check).
        tasks, objs, states, parts = make_inputs(8, ks[7])
        ref = object_encoder_reference(tasks, objs, states, parts, params, pooling)
        out = jax.block_until_ready(
            object_encoder_forward(tasks, objs, states, parts, packed))
        assert out.shape == (8, out_dim), out.shape
        err = float(jnp.max(jnp.abs(out - ref)))
        assert err < 1e-4, f"[{pooling}/f32] max abs err = {err}"

        # bf16 part-encoder matmuls (f32 accumulate); embeddings remain exact.
        out_bf = jax.block_until_ready(
            object_encoder_forward(tasks, objs, states, parts, packed,
                                   compute_dtype=jnp.bfloat16))
        err_bf = float(jnp.max(jnp.abs(out_bf - ref)))
        assert err_bf < 5e-2, f"[{pooling}/bf16] max abs err = {err_bf}"

        # Ragged batch: exercises batch padding + a multi-tile grid.
        tasks, objs, states, parts = make_inputs(20, ks[8])
        ref = object_encoder_reference(tasks, objs, states, parts, params, pooling)
        out = jax.block_until_ready(
            object_encoder_forward(tasks, objs, states, parts, packed,
                                   b_tile_cap=16))
        assert out.shape == (20, out_dim), out.shape
        err = float(jnp.max(jnp.abs(out - ref)))
        assert err < 1e-4, f"[{pooling}/padded] max abs err = {err}"

    print("KERNEL_OK")
</pallas_src>

<mosaic_0001>
module attributes {stable_mosaic.version = 11 : i64} {
  func.func @_object_encoder_kernel(%arg0: i32, %arg1: memref<8x3xi32, #tpu.memory_space<vmem>>, %arg2: memref<8x16xf32, #tpu.memory_space<vmem>>, %arg3: memref<17x256xf32, #tpu.memory_space<vmem>>, %arg4: memref<257x128xf32, #tpu.memory_space<vmem>>, %arg5: memref<128x128xf32, #tpu.memory_space<vmem>>, %arg6: memref<48x128xf32, #tpu.memory_space<vmem>>, %arg7: memref<8x128xf32, #tpu.memory_space<vmem>>) attributes {dimension_semantics = [#tpu.dimension_semantics<parallel>], iteration_bounds = array<i64: 1>, scalar_prefetch = 0 : i64, scratch_operands = 0 : i64, tpu.core_type = #tpu.core_type<tc>, window_params = [{transform_indices = @transform_0, window_bounds = array<i64: 8, 3>}, {transform_indices = @transform_1, window_bounds = array<i64: 8, 16>}, {pipeline_mode = #tpu.pipeline_mode<synchronous>, transform_indices = @transform_2, window_bounds = array<i64: 17, 256>}, {pipeline_mode = #tpu.pipeline_mode<synchronous>, transform_indices = @transform_3, window_bounds = array<i64: 257, 128>}, {pipeline_mode = #tpu.pipeline_mode<synchronous>, transform_indices = @transform_4, window_bounds = array<i64: 128, 128>}, {pipeline_mode = #tpu.pipeline_mode<synchronous>, transform_indices = @transform_5, window_bounds = array<i64: 48, 128>}, {transform_indices = @transform_6, window_bounds = array<i64: 8, 128>}]} {
    %c0 = arith.constant 0 : index
    %c0_0 = arith.constant 0 : index
    %0 = vector.load %arg3[%c0, %c0_0] : memref<17x256xf32, #tpu.memory_space<vmem>>, vector<16x256xf32>
    %c16 = arith.constant 16 : index
    %c0_1 = arith.constant 0 : index
    %1 = vector.load %arg3[%c16, %c0_1] : memref<17x256xf32, #tpu.memory_space<vmem>>, vector<1x256xf32>
    %c0_2 = arith.constant 0 : index
    %c0_3 = arith.constant 0 : index
    %2 = vector.load %arg4[%c0_2, %c0_3] : memref<257x128xf32, #tpu.memory_space<vmem>>, vector<256x128xf32>
    %c256 = arith.constant 256 : index
    %c0_4 = arith.constant 0 : index
    %3 = vector.load %arg4[%c256, %c0_4] : memref<257x128xf32, #tpu.memory_space<vmem>>, vector<1x128xf32>
    %c0_5 = arith.constant 0 : index
    %c0_6 = arith.constant 0 : index
    %4 = vector.load %arg2[%c0_5, %c0_6] : memref<8x16xf32, #tpu.memory_space<vmem>>, vector<8x16xf32>
    %cst = arith.constant dense<0.000000e+00> : vector<8x256xf32>
    %5 = tpu.matmul %4, %0, %cst {dimension_numbers = #tpu.dot_dimension_numbers<[1], [0], [0], [1], [0, 0, 1, 1], [], []>} : vector<8x16xf32>, vector<16x256xf32>, vector<8x256xf32> -> vector<8x256xf32>
    %6 = vector.broadcast %1 : vector<1x256xf32> to vector<8x256xf32>
    %7 = arith.addf %5, %6 : vector<8x256xf32>
    %cst_7 = arith.constant 0.000000e+00 : f32
    %8 = vector.broadcast %cst_7 : f32 to vector<8x256xf32>
    %9 = arith.maximumf %7, %8 : vector<8x256xf32>
    %cst_8 = arith.constant dense<0.000000e+00> : vector<8x128xf32>
    %10 = tpu.matmul %9, %2, %cst_8 {dimension_numbers = #tpu.dot_dimension_numbers<[1], [0], [0], [1], [0, 0, 1, 1], [], []>} : vector<8x256xf32>, vector<256x128xf32>, vector<8x128xf32> -> vector<8x128xf32>
    %11 = vector.broadcast %3 : vector<1x128xf32> to vector<8x128xf32>
    %12 = arith.addf %10, %11 : vector<8x128xf32>
    %c64_i32 = arith.constant 64 : i32
    %13 = tpu.dynamic_rotate %12 by %c64_i32 dim 1 : vector<8x128xf32>, i32 -> vector<8x128xf32>
    %14 = arith.maximumf %12, %13 : vector<8x128xf32>
    %c32_i32 = arith.constant 32 : i32
    %15 = tpu.dynamic_rotate %14 by %c32_i32 dim 1 : vector<8x128xf32>, i32 -> vector<8x128xf32>
    %16 = arith.maximumf %14, %15 : vector<8x128xf32>
    %c16_i32 = arith.constant 16 : i32
    %17 = tpu.dynamic_rotate %16 by %c16_i32 dim 1 : vector<8x128xf32>, i32 -> vector<8x128xf32>
    %18 = arith.maximumf %16, %17 : vector<8x128xf32>
    %c0_9 = arith.constant 0 : index
    %c0_10 = arith.constant 0 : index
    %19 = vector.load %arg5[%c0_9, %c0_10] : memref<128x128xf32, #tpu.memory_space<vmem>>, vector<128x128xf32>
    %cst_11 = arith.constant dense<0.000000e+00> : vector<8x128xf32>
    %20 = tpu.matmul %18, %19, %cst_11 {dimension_numbers = #tpu.dot_dimension_numbers<[1], [0], [0], [1], [0, 0, 1, 1], [], []>} : vector<8x128xf32>, vector<128x128xf32>, vector<8x128xf32> -> vector<8x128xf32>
    %21 = tpu.iota {dimensions = array<i32: 1>} : vector<8x48xi32>
    %c0_12 = arith.constant 0 : index
    %c0_13 = arith.constant 0 : index
    %22 = vector.load %arg1[%c0_12, %c0_13] : memref<8x3xi32, #tpu.memory_space<vmem>>, vector<8x1xi32>
    %23 = vector.broadcast %22 : vector<8x1xi32> to vector<8x48xi32>
    %24 = arith.cmpi eq, %21, %23 : vector<8x48xi32>
    %c0_14 = arith.constant 0 : index
    %c1 = arith.constant 1 : index
    %25 = vector.load %arg1[%c0_14, %c1] : memref<8x3xi32, #tpu.memory_space<vmem>>, vector<8x1xi32>
    %26 = vector.broadcast %25 : vector<8x1xi32> to vector<8x48xi32>
    %27 = arith.cmpi eq, %21, %26 : vector<8x48xi32>
    %28 = arith.ori %24, %27 : vector<8x48xi1>
    %c0_15 = arith.constant 0 : index
    %c2 = arith.constant 2 : index
    %29 = vector.load %arg1[%c0_15, %c2] : memref<8x3xi32, #tpu.memory_space<vmem>>, vector<8x1xi32>
    %30 = vector.broadcast %29 : vector<8x1xi32> to vector<8x48xi32>
    %31 = arith.cmpi eq, %21, %30 : vector<8x48xi32>
    %32 = arith.ori %28, %31 : vector<8x48xi1>
    %33 = arith.extui %32 : vector<8x48xi1> to vector<8x48xi32>
    %34 = arith.sitofp %33 : vector<8x48xi32> to vector<8x48xf32>
    %c0_16 = arith.constant 0 : index
    %c0_17 = arith.constant 0 : index
    %35 = vector.load %arg6[%c0_16, %c0_17] : memref<48x128xf32, #tpu.memory_space<vmem>>, vector<48x128xf32>
    %cst_18 = arith.constant dense<0.000000e+00> : vector<8x128xf32>
    %36 = tpu.matmul %34, %35, %cst_18 {dimension_numbers = #tpu.dot_dimension_numbers<[1], [0], [0], [1], [0, 0, 1, 1], [], []>} : vector<8x48xf32>, vector<48x128xf32>, vector<8x128xf32> -> vector<8x128xf32>
    %37 = arith.addf %36, %20 : vector<8x128xf32>
    %c0_19 = arith.constant 0 : index
    %c0_20 = arith.constant 0 : index
    %38 = vector.load %arg7[%c0_19, %c0_20] : memref<8x128xf32, #tpu.memory_space<vmem>>, vector<8x128xf32>
    tpu.vector_store %arg7[%c0_19, %c0_20], %37 {strides = array<i32>} : memref<8x128xf32, #tpu.memory_space<vmem>>, vector<8x128xf32>,
    return
  }
  func.func @transform_0(%arg0: i32) -> (i32, i32) {
    %c0_i32 = arith.constant 0 : i32
    %c0_i32_0 = arith.constant 0 : i32
    return %arg0, %c0_i32 : i32, i32
  }
  func.func @transform_1(%arg0: i32) -> (i32, i32) {
    %c0_i32 = arith.constant 0 : i32
    %c0_i32_0 = arith.constant 0 : i32
    return %arg0, %c0_i32 : i32, i32
  }
  func.func @transform_2(%arg0: i32) -> (i32, i32) {
    %c0_i32 = arith.constant 0 : i32
    %c0_i32_0 = arith.constant 0 : i32
    %c0_i32_1 = arith.constant 0 : i32
    return %c0_i32, %c0_i32_0 : i32, i32
  }
  func.func @transform_3(%arg0: i32) -> (i32, i32) {
    %c0_i32 = arith.constant 0 : i32
    %c0_i32_0 = arith.constant 0 : i32
    %c0_i32_1 = arith.constant 0 : i32
    return %c0_i32, %c0_i32_0 : i32, i32
  }
  func.func @transform_4(%arg0: i32) -> (i32, i32) {
    %c0_i32 = arith.constant 0 : i32
    %c0_i32_0 = arith.constant 0 : i32
    %c0_i32_1 = arith.constant 0 : i32
    return %c0_i32, %c0_i32_0 : i32, i32
  }
  func.func @transform_5(%arg0: i32) -> (i32, i32) {
    %c0_i32 = arith.constant 0 : i32
    %c0_i32_0 = arith.constant 0 : i32
    %c0_i32_1 = arith.constant 0 : i32
    return %c0_i32, %c0_i32_0 : i32, i32
  }
  func.func @transform_6(%arg0: i32) -> (i32, i32) {
    %c0_i32 = arith.constant 0 : i32
    %c0_i32_0 = arith.constant 0 : i32
    return %arg0, %c0_i32 : i32, i32
  }
}

</mosaic_0001>

<bundles_post_ra>
// kernel: tpu_custom_call.1
= control target key start
LH: loop header
LB: loop body
LE: loop exit
PB: predicated region body
PF: predicated region fallthrough
CT: control target
= control target key end

     0   :  { %11 = vsyncpa [#allocation3], 0  ;;  %s976_s0 = inlined_call_operand.vmem [shape: s32[8,3], index: 0, kind: input, shape index: {}]   ;;  %s977_s1 = inlined_call_operand.vmem [shape: f32[8,16], index: 1, kind: input, shape index: {}]   ;;  %s978_s2 = inlined_call_operand.hbm [shape: f32[17,256], index: 2, kind: input, shape index: {}]   ;;  %s979_s3 = inlined_call_operand.hbm [shape: f32[257,128], index: 3, kind: input, shape index: {}]   ;;  %s980_s4 = inlined_call_operand.hbm [shape: f32[128,128], index: 4, kind: input, shape index: {}]   ;;  %s981_s5 = inlined_call_operand.hbm [shape: f32[48,128], index: 5, kind: input, shape index: {}]   ;;  %s982_s6 = inlined_call_operand.hbm [shape: f32[8,128], index: 6, kind: output, shape index: {}]  }
   0x1   :  { %12 = vsyncpa [#allocation6], 0 }
   0x2   :  { %13 = vsyncpa [#allocation9], 0 }
   0x3   :  { %14 = vsyncpa [#allocation4], 0  ;;  %s816_s21 = smov [#allocation5]   ;;  %s698_s25 = scalar_lea.hbm %s979_s3, 4224 }
   0x4   :  { %s36_s22 = sshll.u32 %s816_s21, 4  ;;  %p699_p0 = scmp.ne.s32.totalorder %s979_s3, %s698_s25  ;;  %s37_s22 = int_to_ptr.vmem [resolvable:$true] %s36_s22 }
   0x5   :  { %p702_p1 = scmp.lt.u32.totalorder %s698_s25, %s979_s3 }
   0x7   :  { %p704_p2 = pnand %p702_p1, %p699_p0 }
   0x9   :  { %707 = shalt.err (!%p704_p2)
}
   0xa   :  { %s708_s30 = scalar_lea.vmem %s37_s22, 4224  ;;  %p713_p4 = scmp.lt.s32.totalorder %s37_s22, %s37_s22 }
   0xb   :  { %p709_p3 = scmp.ne.s32.totalorder %s37_s22, %s708_s30  ;;  %p714_p5 = scmp.lt.s32.totalorder %s708_s30, %s708_s30 }
   0xd   :  { %p715_p6 = por %p714_p5, %p713_p4 }
   0xf   :  { %p716_p7 = pnand %p715_p6, %p709_p3 }
  0x11   :  { %719 = shalt.err (!%p716_p7)
}
  0x12   :  { %s817_s7 = smov 128   ;;  %s818_s8 = smov 8  }
  0x13   :  { %42 = dma.hbm_to_vmem [thread:$0]  %s979_s3, 4224, %s37_s22, [#allocation6], %s817_s7, %s817_s7, %s818_s8  }
  0x14   :  { %s819_s11 = smov [#allocation2]   ;;  %s720_s15 = scalar_lea.hbm %s978_s2, 768 }
  0x15   :  { %s24_s12 = sshll.u32 %s819_s11, 4  ;;  %p721_p8 = scmp.ne.s32.totalorder %s978_s2, %s720_s15  ;;  %s25_s12 = int_to_ptr.vmem [resolvable:$true] %s24_s12 }
  0x16   :  { %p724_p9 = scmp.lt.u32.totalorder %s720_s15, %s978_s2 }
  0x18   :  { %p726_p10 = pnand %p724_p9, %p721_p8 }
  0x1a   :  { %729 = shalt.err (!%p726_p10)
}
  0x1b   :  { %s730_s20 = scalar_lea.vmem %s25_s12, 768  ;;  %p735_p12 = scmp.lt.s32.totalorder %s25_s12, %s25_s12 }
  0x1c   :  { %p731_p11 = scmp.ne.s32.totalorder %s25_s12, %s730_s20  ;;  %p736_p13 = scmp.lt.s32.totalorder %s730_s20, %s730_s20 }
  0x1e   :  { %p737_p0 = por %p736_p13, %p735_p12 }
  0x20   :  { %p738_p1 = pnand %p737_p0, %p731_p11 }
  0x22   :  { %741 = shalt.err (!%p738_p1)
}
  0x23   :  { %s820_s3 = smov 256   ;;  %s821_s21 = smov 16  }
  0x24   :  { %30 = dma.hbm_to_vmem [thread:$0]  %s978_s2, 768, %s25_s12, [#allocation3], %s820_s3, %s820_s3, %s821_s21  }
  0x25   :  { %s822_s24 = smov [#allocation7]   ;;  %s823_s26 = smov [#allocation8]  }
  0x26   :  { %s48_s25 = sshll.u32 %s822_s24, 4  ;;  %s60_s27 = sshll.u32 %s823_s26, 4  ;;  %s49_s25 = int_to_ptr.vmem [resolvable:$true] %s48_s25  ;;  %s896_s27 = int_to_ptr.vmem [resolvable:$true] %s60_s27 }
  0x27   :  { %s742_s30 = scalar_lea.hbm %s980_s4, 2048 }
  0x28   :  { %p743_p2 = scmp.ne.s32.totalorder %s980_s4, %s742_s30  ;;  %p746_p3 = scmp.lt.u32.totalorder %s742_s30, %s980_s4 }
  0x2a   :  { %p748_p4 = pnand %p746_p3, %p743_p2 }
  0x2c   :  { %751 = shalt.err (!%p748_p4)
}
  0x2d   :  { %s752_s2 = scalar_lea.vmem %s49_s25, 2048  ;;  %p757_p6 = scmp.lt.s32.totalorder %s49_s25, %s49_s25 }
  0x2e   :  { %p753_p5 = scmp.ne.s32.totalorder %s49_s25, %s752_s2  ;;  %p758_p7 = scmp.lt.s32.totalorder %s752_s2, %s752_s2 }
  0x30   :  { %p759_p8 = por %p758_p7, %p757_p6 }
  0x32   :  { %p760_p9 = pnand %p759_p8, %p753_p5 }
  0x34   :  { %763 = shalt.err (!%p760_p9)
}
  0x35   :  { %54 = dma.hbm_to_vmem [thread:$0]  %s980_s4, 2048, %s49_s25, [#allocation6], %s817_s7, %s817_s7, %s818_s8  }
  0x36   :  { %s764_s17 = scalar_lea.hbm %s981_s5, 768 }
  0x37   :  { %p765_p10 = scmp.ne.s32.totalorder %s981_s5, %s764_s17  ;;  %p768_p11 = scmp.lt.u32.totalorder %s764_s17, %s981_s5 }
  0x39   :  { %p770_p12 = pnand %p768_p11, %p765_p10 }
  0x3b   :  { %773 = shalt.err (!%p770_p12)
}
  0x3c   :  { %s774_s22 = scalar_lea.vmem %s896_s27, 768  ;;  %p779_p0 = scmp.lt.s32.totalorder %s896_s27, %s896_s27 }
  0x3d   :  { %p775_p13 = scmp.ne.s32.totalorder %s896_s27, %s774_s22  ;;  %p780_p1 = scmp.lt.s32.totalorder %s774_s22, %s774_s22 }
  0x3f   :  { %p781_p2 = por %p780_p1, %p779_p0 }
  0x41   :  { %p782_p3 = pnand %p781_p2, %p775_p13 }
  0x43   :  { %785 = shalt.err (!%p782_p3)
}
  0x44   :  { %66 = dma.hbm_to_vmem [thread:$0]  %s981_s5, 768, %s896_s27, [#allocation9], %s817_s7, %s817_s7, %s818_s8  }
  0x45   :  { %808 = dma.done.wait [#allocation3], 768  }
  0x46   :  { %809 = vsyncadd [#allocation3], 4294966528 }
  0x47   :  { %810 = dma.done.wait [#allocation6], 6272  }
  0x48   :  { %811 = vsyncadd [#allocation6], 4294961024 }
  0x49   :  { %812 = dma.done.wait [#allocation9], 768  }
  0x4a   :  { %813 = vsyncadd [#allocation9], 4294966528  ;;  %v824_v0 = vmov 0.0   ;;  %v80_v1 = vld [vmem:[#allocation2 + $0x8] sm:$0xff]  ;;  %v82_v2 = vld [vmem:[#allocation2 + $0x18] sm:$0xff]  ;;  %vm130_vm0 = vcmask 130048   ;;  %v120_v56 = vlaneseq }
  0x4b   :  { %198 = vmatprep.mubr.f32.mxu1 %v824_v0  ;;  %v79_v3 = vld [vmem:[#allocation2] sm:$0xff]  ;;  %v606_v4 = vpack.c.bf16 %v82_v2, %v80_v1  ;;  %v81_v5 = vld [vmem:[#allocation2 + $0x10] sm:$0xff]  ;;  %v102_v8 = vld [vmem:[#allocation5 + $0x88] sm:$0xff]  ;;  %s827_s24 = smov 64   ;;  %vm831_vm1 = vmmov 0   ;;  %vm401_vm6 = vcmask 392192  }
  0x4c   :  { %v101_v6 = vld [vmem:[#allocation5 + $0x80] sm:$0xff]  ;;  %v608_v7 = vpack.c.bf16 %v81_v5, %v79_v3  ;;  %v86_v10 = vld [vmem:[#allocation5 + $0x8] sm:$0xff]  ;;  %v103_v12 = vld [vmem:[#allocation5 + $0x90] sm:$0xff]  ;;  %v121_v57 = vshrl.u32 %v120_v56, 7  ;;  %588 = vmatprep.mubr.msk.f32.mxu0 %vm831_vm1, %v824_v0 }
  0x4d   :  { %v85_v9 = vld [vmem:[#allocation5] sm:$0xff]  ;;  %607 = vmatprep.subr.bf16.mxu1 %v606_v4  ;;  %v610_v11 = vpack.c.bf16 %v102_v8, %v101_v6  ;;  %v104_v13 = vld [vmem:[#allocation5 + $0x98] sm:$0xff]  ;;  %v118_v14 = vld [vmem:[%s977_s1] sm:$0xff]  ;;  %v826_v8 = vmov 1  }
  0x4e   :  { %609 = vmatpush1.bf16.msra.mxu1 %v608_v7  ;;  %v612_v15 = vpack.c.bf16 %v86_v10, %v85_v9  ;;  %v614_v16 = vpack.c.bf16 %v104_v13, %v103_v12  ;;  %v87_v17 = vld [vmem:[#allocation5 + $0x10] sm:$0xff]  ;;  %v88_v18 = vld [vmem:[#allocation5 + $0x18] sm:$0xff]  ;;  %v105_v19 = vld [vmem:[#allocation5 + $0xa0] sm:$0xff]  ;;  %v122_v58 = vsub.s32 0, %v121_v57  ;;  %v126_v60 = vsub.s32 1, %v121_v57  ;;  %695 = vset.pattern.permute.xlu0 %v826_v8 }
  0x4f   :  { %611 = vmatprep.subr.bf16.mxu1 %v610_v11  ;;  %v106_v20 = vld [vmem:[#allocation5 + $0xa8] sm:$0xff]  ;;  %v616_v21 = vpack.c.bf16 %v88_v18, %v87_v17  ;;  %v89_v23 = vld [vmem:[#allocation5 + $0x20] sm:$0xff]  ;;  %v107_v25 = vld [vmem:[#allocation5 + $0xb0] sm:$0xff]  ;;  %v825_v7 = vmov 0   ;;  %v829_v18 = vmov 0.0|0.0   ;;  %v377_v57 = vand.u32 127, %v120_v56 }
  0x50   :  { %v618_v22 = vpack.c.bf16 %v106_v20, %v105_v19  ;;  %v90_v24 = vld [vmem:[#allocation5 + $0x28] sm:$0xff]  ;;  %v108_v26 = vld [vmem:[#allocation5 + $0xb8] sm:$0xff]  ;;  %v91_v29 = vld [vmem:[#allocation5 + $0x30] sm:$0xff]  ;;  %694 = vset.pattern.permute.xlu1 %v825_v7  ;;  %642 = vmatprep.subr.bf16.mxu0 %v829_v18 }
  0x51   :  { %493 = vmatmul.mubr.msk.f32.vlgmr.msra.gmra.mrb[0].mxu1 %vm130_vm0, %v118_v14  ;;  %v620_v27 = vpack.c.bf16 %v90_v24, %v89_v23  ;;  %v622_v28 = vpack.c.bf16 %v108_v26, %v107_v25  ;;  %v92_v30 = vld [vmem:[#allocation5 + $0x38] sm:$0xff]  ;;  %v109_v31 = vld [vmem:[#allocation5 + $0xc0] sm:$0xff]  ;;  %v110_v32 = vld [vmem:[#allocation5 + $0xc8] sm:$0xff]  ;;  %v828_v14 = vmov 2  }
  0x52   :  { %613 = vmatpush3.bf16.msra.mxu1 %v612_v15  ;;  %v624_v33 = vpack.c.bf16 %v92_v30, %v91_v29  ;;  %v626_v34 = vpack.c.bf16 %v110_v32, %v109_v31  ;;  %v93_v35 = vld [vmem:[#allocation5 + $0x40] sm:$0xff]  ;;  %v94_v36 = vld [vmem:[#allocation5 + $0x48] sm:$0xff]  ;;  %v111_v37 = vld [vmem:[#allocation5 + $0xd0] sm:$0xff] }
  0x53   :  { %615 = vmatprep.subr.bf16.mxu1 %v614_v16  ;;  %v112_v38 = vld [vmem:[#allocation5 + $0xd8] sm:$0xff]  ;;  %v628_v39 = vpack.c.bf16 %v94_v36, %v93_v35  ;;  %v95_v41 = vld [vmem:[#allocation5 + $0x50] sm:$0xff]  ;;  %v113_v43 = vld [vmem:[#allocation5 + $0xe0] sm:$0xff] }
  0x54   :  { %v630_v40 = vpack.c.bf16 %v112_v38, %v111_v37  ;;  %v96_v42 = vld [vmem:[#allocation5 + $0x58] sm:$0xff]  ;;  %v114_v44 = vld [vmem:[#allocation5 + $0xe8] sm:$0xff]  ;;  %v97_v47 = vld [vmem:[#allocation5 + $0x60] sm:$0xff] }
  0x55   :  { %v632_v45 = vpack.c.bf16 %v96_v42, %v95_v41  ;;  %v634_v46 = vpack.c.bf16 %v114_v44, %v113_v43  ;;  %v98_v48 = vld [vmem:[#allocation5 + $0x68] sm:$0xff]  ;;  %v115_v50 = vld [vmem:[#allocation5 + $0xf0] sm:$0xff]  ;;  %v116_v51 = vld [vmem:[#allocation5 + $0xf8] sm:$0xff] }
  0x56   :  { %617 = vmatpush3.bf16.msra.mxu1 %v616_v21  ;;  %v636_v49 = vpack.c.bf16 %v98_v48, %v97_v47  ;;  %v638_v52 = vpack.c.bf16 %v116_v51, %v115_v50  ;;  %v99_v53 = vld [vmem:[#allocation5 + $0x70] sm:$0xff]  ;;  %v100_v54 = vld [vmem:[#allocation5 + $0x78] sm:$0xff]  ;;  %v941_v6 = vld [vmem:[%s976_s0] sm:$0xff]  ;;  %s830_s0 = smov 32  }
  0x57   :  { %619 = vmatprep.subr.bf16.mxu1 %v618_v22  ;;  %v640_v55 = vpack.c.bf16 %v100_v54, %v99_v53  ;;  %v84_v59 = vld [vmem:[#allocation2 + $0x20] ss:$8 sm:$0x3]  ;;  %380 = vperm.xlu1 %694, %v941_v6   ;;  %v494_v11 = vld [vmem:[#allocation5 + $0x100] ss:$0 sm:$0xff]  ;;  %v290_v15 = vld [vmem:[#allocation7] sm:$0xff] }
  0x58   :  { %v123_v61 = vrot.slane %v84_v59, %v122_v58  ;;  %v127_v62 = vrot.slane %v84_v59, %v126_v60  ;;  %v291_v16 = vld [vmem:[#allocation7 + $0x8] sm:$0xff]  ;;  %v292_v17 = vld [vmem:[#allocation7 + $0x10] sm:$0xff]  ;;  %v293_v20 = vld [vmem:[#allocation7 + $0x18] sm:$0xff] }
  0x59   :  { %v643_v19 = vpack.c.bf16 %v291_v16, %v290_v15  ;;  %v646_v21 = vpack.c.bf16 %v293_v20, %v292_v17  ;;  %v294_v23 = vld [vmem:[#allocation7 + $0x20] sm:$0xff]  ;;  %v295_v24 = vld [vmem:[#allocation7 + $0x28] sm:$0xff]  ;;  %v397_v50 = vld [vmem:[#allocation8 + $0x10] sm:$0xff] }
  0x5a   :  { %621 = vmatpush3.bf16.msra.mxu1 %v620_v27  ;;  %v649_v26 = vpack.c.bf16 %v295_v24, %v294_v23  ;;  %v296_v27 = vld [vmem:[#allocation7 + $0x30] sm:$0xff]  ;;  %v298_v30 = vld [vmem:[#allocation7 + $0x40] sm:$0xff]  ;;  %v299_v31 = vld [vmem:[#allocation7 + $0x48] sm:$0xff] }
  0x5b   :  { %623 = vmatprep.subr.bf16.mxu1 %v622_v28  ;;  %696 = vset.pattern.permute.xlu1 %v828_v14  ;;  %v297_v28 = vld [vmem:[#allocation7 + $0x38] sm:$0xff]  ;;  %v655_v32 = vpack.c.bf16 %v299_v31, %v298_v30  ;;  %v302_v36 = vld [vmem:[#allocation7 + $0x60] sm:$0xff]  ;;  %v303_v37 = vld [vmem:[#allocation7 + $0x68] sm:$0xff] }
  0x5c   :  { %644 = vmatpush3.bf16.msra.mxu0 %v643_v19  ;;  %v652_v29 = vpack.c.bf16 %v297_v28, %v296_v27  ;;  %v661_v38 = vpack.c.bf16 %v303_v37, %v302_v36  ;;  %v398_v51 = vld [vmem:[#allocation8 + $0x18] sm:$0xff]  ;;  %v399_v53 = vld [vmem:[#allocation8 + $0x20] sm:$0xff]  ;;  %v400_v54 = vld [vmem:[#allocation8 + $0x28] sm:$0xff] }
  0x5d   :  { %645 = vmatprep.subr.bf16.mxu0 %v829_v18 }
  0x5e   :  { %625 = vmatpush3.bf16.msra.mxu1 %v624_v33  ;;  %v300_v33 = vld [vmem:[#allocation7 + $0x50] sm:$0xff] }
  0x5f   :  { %627 = vmatprep.subr.bf16.mxu1 %v626_v34  ;;  %v301_v34 = vld [vmem:[#allocation7 + $0x58] sm:$0xff] }
  0x60   :  { %647 = vmatpush3.bf16.msra.mxu0 %v646_v21  ;;  %v658_v35 = vpack.c.bf16 %v301_v34, %v300_v33 }
  0x61   :  { %648 = vmatprep.subr.bf16.mxu0 %v829_v18 }
  0x62   :  { %629 = vmatpush3.bf16.msra.mxu1 %v628_v39  ;;  %v304_v39 = vld [vmem:[#allocation7 + $0x70] sm:$0xff] }
  0x63   :  { %631 = vmatprep.subr.bf16.mxu1 %v630_v40  ;;  %v305_v40 = vld [vmem:[#allocation7 + $0x78] sm:$0xff] }
  0x64   :  { %650 = vmatpush3.bf16.msra.mxu0 %v649_v26  ;;  %v664_v41 = vpack.c.bf16 %v305_v40, %v304_v39 }
  0x65   :  { %651 = vmatprep.subr.bf16.mxu0 %v829_v18 }
  0x66   :  { %633 = vmatpush3.bf16.msra.mxu1 %v632_v45  ;;  %v395_v45 = vld [vmem:[#allocation8] sm:$0xff] }
  0x67   :  { %635 = vmatprep.subr.bf16.mxu1 %v634_v46  ;;  %v396_v46 = vld [vmem:[#allocation8 + $0x8] sm:$0xff] }
  0x68   :  { %653 = vmatpush3.bf16.msra.mxu0 %v652_v29  ;;  %v667_v48 = vpack.c.bf16 %v396_v46, %v395_v45 }
  0x69   :  { %654 = vmatprep.subr.bf16.mxu0 %v829_v18 }
  0x6a   :  { %637 = vmatpush3.bf16.msra.mxu1 %v636_v49 }
  0x6b   :  { %639 = vmatprep.subr.bf16.mxu1 %v638_v52  ;;  %v670_v52 = vpack.c.bf16 %v398_v51, %v397_v50 }
  0x6c   :  { %656 = vmatpush3.bf16.msra.mxu0 %v655_v32 }
  0x6d   :  { %657 = vmatprep.subr.bf16.mxu0 %v829_v18 }
  0x6e   :  { %641 = vmatpush3.bf16.msra.mxu1 %v640_v55  ;;  %v673_v55 = vpack.c.bf16 %v400_v54, %v399_v53 }
  0x70   :  { %659 = vmatpush3.bf16.msra.mxu0 %v658_v35 }
  0x71   :  { %660 = vmatprep.subr.bf16.mxu0 %v829_v18 }
  0x74   :  { %662 = vmatpush3.bf16.msra.mxu0 %v661_v38 }
  0x75   :  { %663 = vmatprep.subr.bf16.mxu0 %v829_v18 }
  0x78   :  { %665 = vmatpush3.bf16.msra.mxu0 %v664_v41 }
  0x79   :  { %666 = vmatprep.subr.bf16.mxu0 %v829_v18 }
  0xd6   :  { %v381_v44 = vpop.permute.xlu1 %380 }
  0xd7   :  { %vm382_vm2 = vcmp.eq.s32.totalorder %v377_v57, %v381_v44 }
 0x124   :  { %v200_v63 = vpop.f32.mrb[0].mxu1 }
 0x125   :  { %v201_v1 = vadd.f32 %v200_v63, %v123_v61  ;;  %v202_v2 = vpop.f32.mrb[1].mxu1 }
 0x126   :  { %v203_v3 = vadd.f32 %v202_v2, %v127_v62 }
 0x127   :  { %v205_v5 = vmax.f32 %v201_v1, 0.0 }
 0x128   :  { %v206_v4 = vmax.f32 %v203_v3, 0.0 }
 0x12a   :  { %275 = vmatprep.mubr.f32.mxu1 %v206_v4 }
 0x12b   :  { %276 = vmatmul.mubr.f32.vlgmr.msra.gmra.mrb[2].mxu1 %v205_v5 }
 0x1fe   :  { %v529_v9 = vpop.f32.mrb[2].mxu1 }
 0x1ff   :  { %v530_v10 = vpop.f32.mrb[3].mxu1 }
 0x200   :  { %v531_v12 = vadd.f32 %v530_v10, %v529_v9 }
 0x202   :  { %v278_v13 = vadd.f32 %v531_v12, %v494_v11 }
 0x204   :  { %281 = vrot.lane.b32.xlu0 %v278_v13, %s827_s24 }
 0x276   :  { %v282_v22 = vpop.permute.xlu0 %281 }
 0x277   :  { %v283_v25 = vmax.f32 %v278_v13, %v282_v22 }
 0x279   :  { %284 = vrot.lane.b32.xlu0 %v283_v25, %s830_s0 }
 0x27d   :  { %384 = vperm.xlu0 %695, %v941_v6  }
 0x281   :  { %697 = vset.pattern.permute.xlu0 %v828_v14 }
 0x2eb   :  { %v285_v42 = vpop.permute.xlu0 %284 }
 0x2ec   :  { %v286_v43 = vmax.f32 %v283_v25, %v285_v42 }
 0x2ee   :  { %287 = vrot.lane.b32.xlu1 %v286_v43, %s821_s21  ;;  %s832_s21 = smov [#allocation10]  }
 0x2ef   :  { %s482_s25 = sshll.u32 %s832_s21, 4  ;;  %s483_s25 = int_to_ptr.vmem [resolvable:$true] %s482_s25 }
 0x2f0   :  { %s786_s26 = scalar_lea.vmem %s483_s25, 128  ;;  %p791_p5 = scmp.lt.s32.totalorder %s483_s25, %s483_s25 }
 0x2f1   :  { %p787_p4 = scmp.ne.s32.totalorder %s483_s25, %s786_s26  ;;  %p792_p6 = scmp.lt.s32.totalorder %s786_s26, %s786_s26 }
 0x2f2   :  { %389 = vperm.xlu1 %696, %v941_v6  }
 0x2f3   :  { %p793_p7 = por %p792_p6, %p791_p5 }
 0x2f5   :  { %p794_p8 = pnand %p793_p7, %p787_p4 }
 0x2fc   :  { %v385_v58 = vpop.permute.xlu0 %384 }
 0x2fd   :  { %vm386_vm3 = vcmp.eq.s32.totalorder %v377_v57, %v385_v58 }
 0x2fe   :  { %vm387_vm4 = vmor %vm382_vm2, %vm386_vm3 }
 0x360   :  { %v288_v47 = vpop.permute.xlu1 %287 }
 0x361   :  { %v289_v49 = vmax.f32 %v286_v43, %v288_v47 }
 0x363   :  { %589 = vmatmul.mubr.f32.vlgmr.msra.gmra.mrb[0].mxu0 %v289_v49 }
 0x364   :  { %668 = vmatpush3.bf16.msra.mxu0 %v667_v48  ;;  %603 = vmatprep.mubr.msk.f32.mxu0 %vm831_vm1, %v824_v0 }
 0x365   :  { %669 = vmatprep.subr.bf16.mxu0 %v829_v18 }
 0x368   :  { %671 = vmatpush3.bf16.msra.mxu0 %v670_v52 }
 0x369   :  { %672 = vmatprep.subr.bf16.mxu0 %v829_v18 }
 0x36c   :  { %674 = vmatpush3.bf16.msra.mxu0 %v673_v55 }
 0x371   :  { %v390_v59 = vpop.permute.xlu1 %389 }
 0x372   :  { %vm391_vm5 = vcmp.eq.s32.totalorder %v377_v57, %v390_v59 }
 0x373   :  { %vm392_vm7 = vmor %vm387_vm4, %vm391_vm5 }
 0x374   :  { %v495_v60 = vsel %vm392_vm7, 1.0, %v824_v0 }
 0x375   :  { %604 = vmatmul.mubr.msk.f32.vlgmr.msra.gmra.mrb[0].mxu0 %vm401_vm6, %v495_v60 }
 0x448   :  { %v471_v61 = vpop.f32.mrb[0].mxu0 }
 0x449   :  { %475 = vst [vmem:[#allocation10] sm:$0xff] %v471_v61  ;;  %v605_v62 = vpop.f32.mrb[1].mxu0 }
 0x44a   :  { %797 = shalt.err (!%p794_p8)
}
 0x44b   :  { %s798_s29 = scalar_lea.hbm %s982_s6, 128 }
 0x44c   :  { %p799_p9 = scmp.ne.s32.totalorder %s982_s6, %s798_s29  ;;  %p802_p10 = scmp.lt.u32.totalorder %s798_s29, %s982_s6 }
 0x44e   :  { %p804_p11 = pnand %p802_p10, %p799_p9 }
 0x450   :  { %807 = shalt.err (!%p804_p11)
}
 0x451   :  { %485 = dma.vmem_to_hbm [thread:$0]  %s483_s25, 128, %s982_s6, [#allocation4]  }
 0x452   :  { %814 = dma.done.wait [#allocation4], 128  }
 0x453   :  { %815 = vsyncadd [#allocation4], 4294967168 }
 0x454   :  { %489 = vsyncpa [#allocation3], 1 }
 0x455   :  { %490 = vsyncpa [#allocation6], 1 }
 0x456   :  { %491 = vsyncpa [#allocation9], 1 }
 0x457   :  { %492 = vsyncpa [#allocation4], 1 }

</bundles_post_ra>
